<compile_context>
chip_gen: v7x
topology: tpu7x:2x2x1
jax: 0.10.0
libtpu: 0.0.40
codegen_flags: <defaults>
</compile_context>

<pallas_src>
import functools

import numpy as np
import jax
import jax.numpy as jnp
from jax.experimental import pallas as pl
from jax.experimental.pallas import tpu as pltpu

_LANE = 128
_TM_MAX = 512                      # max row tile (512 -> 1024 buys ~1%, skip)
_SPLIT_ROWS = 128                  # >= this many rows: force >=2 row tiles
_VMEM_TILE_BUDGET = 28 * 1024 * 1024
_VMEM_LIMIT_BYTES = 32 * 1024 * 1024
_DTYPES = {"float32": jnp.float32, "bfloat16": jnp.bfloat16}


def _round_up(a: int, b: int) -> int:
    return -(-a // b) * b


def _cdiv(a: int, b: int) -> int:
    return -(-a // b)


def _notaknot_spline_matrix(w: int, upsample_rate: int) -> np.ndarray:
    """Dense (w*r, w) matrix M such that M @ z reproduces
    splev(linspace(0, w-1, w*r), splrep(linspace(0, w-1, w), z), der=0)."""
    assert w >= 4, "cubic splrep needs at least 4 samples (m > k)"
    n = w
    x = np.linspace(0.0, w - 1, w, dtype=np.float64)
    xq = np.linspace(0.0, w - 1, w * upsample_rate, dtype=np.float64)
    dx = np.diff(x)

    # Apply the (linear) spline fit to the identity -> columns are unit vectors.
    Y = np.eye(n, dtype=np.float64)
    slope = np.diff(Y, axis=0) / dx[:, None]            # (n-1, n)

    # Node first-derivatives with not-a-knot boundary conditions
    # (identical to splrep's interpolating cubic spline for n >= 4).
    A = np.zeros((n, n), dtype=np.float64)
    b = np.zeros((n, n), dtype=np.float64)
    for i in range(1, n - 1):
        A[i, i - 1] = dx[i]
        A[i, i] = 2.0 * (dx[i - 1] + dx[i])
        A[i, i + 1] = dx[i - 1]
        b[i] = 3.0 * (dx[i] * slope[i - 1] + dx[i - 1] * slope[i])
    d0 = x[2] - x[0]
    A[0, 0] = dx[1]
    A[0, 1] = d0
    b[0] = ((dx[0] + 2.0 * d0) * dx[1] * slope[0] + dx[0] ** 2 * slope[1]) / d0
    dn = x[-1] - x[-3]
    A[-1, -1] = dx[-2]
    A[-1, -2] = dn
    b[-1] = (dx[-1] ** 2 * slope[-2] + (2.0 * dn + dx[-1]) * dx[-2] * slope[-1]) / dn
    s = np.linalg.solve(A, b)                           # (n, n)

    # Piecewise cubic Hermite coefficients per interval (per basis column).
    t = (s[:-1] + s[1:] - 2.0 * slope) / dx[:, None]
    c0 = t / dx[:, None]
    c1 = (slope - s[:-1]) / dx[:, None] - t
    c2 = s[:-1]
    c3 = Y[:-1]

    idx = np.clip(np.searchsorted(x, xq, side="right") - 1, 0, n - 2)
    h = (xq - x[idx])[:, None]
    M = ((c0[idx] * h + c1[idx]) * h + c2[idx]) * h + c3[idx]   # (w*r, w)
    return M


@functools.lru_cache(maxsize=None)
def _cached_spline_matrix_t(w: int, r: int, n_cols: int, dtype_name: str):
    """(w, n_cols) transposed spline matrix (zero-padded columns), on device.

    TODO(synk): cached on the device active at first call; re-place explicitly
    for multi-device / explicit-sharding deployments."""
    M = _notaknot_spline_matrix(w, r)                    # (w*r, w) float64
    Mt = np.zeros((w, n_cols), dtype=np.float64)
    Mt[:, : w * r] = M.T
    return jnp.asarray(Mt, dtype=_DTYPES[dtype_name])


def _spline_matmul_kernel(x_ref, mt_ref, o_ref):
    # (TM, w) @ (w, TN) on the MXU with f32 accumulation; cast on store so the
    # dominant output write stream follows the storage dtype in bf16 mode.
    o_ref[...] = jnp.dot(x_ref[...], mt_ref[...],
                         preferred_element_type=jnp.float32).astype(o_ref.dtype)


@functools.lru_cache(maxsize=None)
def _make_spline_fn(B: int, w: int, N: int, storage_name: str, out_name: str):
    """Returns (jitted launcher taking (x, mt), required M^T column count)."""
    storage = _DTYPES[storage_name]
    out_dtype = _DTYPES[out_name]
    s_item = np.dtype(storage).itemsize
    o_item = np.dtype(out_dtype).itemsize
    sub_q = 16 if min(s_item, o_item) == 2 else 8        # bf16 packs [16,128] vregs
    w_lanes = _round_up(w, _LANE)                        # lane footprint of x tile
    w_sub = _round_up(w, sub_q)                          # sublane footprint of M^T
    Np = _round_up(N, _LANE)

    def vmem_bytes(tm, tn, nbuf):
        return nbuf * (tm * w_lanes * s_item + w_sub * tn * s_item
                       + tm * tn * o_item)

    cost = pl.CostEstimate(
        flops=2 * B * w * N, transcendentals=0,
        bytes_accessed=B * w * s_item + w * N * s_item + B * N * o_item)

    if B < _SPLIT_ROWS and vmem_bytes(_round_up(B, sub_q), Np, 1) <= _VMEM_TILE_BUDGET:
        # ---- Single-block fast path: no grid, no pipeline-step overhead. ----
        # Whole (unpadded) arrays become full-extent VMEM blocks; the ragged
        # lane tail of the (B, N) output is masked by Mosaic on writeback.
        call = pl.pallas_call(
            _spline_matmul_kernel,
            out_shape=jax.ShapeDtypeStruct((B, N), out_dtype),
            compiler_params=pltpu.CompilerParams(
                vmem_limit_bytes=_VMEM_LIMIT_BYTES),
            cost_estimate=cost,
        )
        mt_cols = N
    else:
        # ---- Tiled, auto-pipelined path. -------------------------------------
        # TN: largest multiple of 128 (<= Np) whose double-buffered M^T tile
        # uses at most half the budget.  Common case: TN == Np, so M^T is fully
        # resident (constant block index -> DMA'd once) and x is read once.
        max_tn = (_VMEM_TILE_BUDGET // 2) // max(1, 2 * w_sub * s_item)
        TN = max(_LANE, min(Np, (max_tn // _LANE) * _LANE))
        mt_cols = _round_up(N, TN)
        n_col = mt_cols // TN

        # TM: balanced row tiles over a cdiv grid (final tile masked), at most
        # _TM_MAX rows; >=2 tiles for B >= _SPLIT_ROWS so both v7x TCs get work.
        TM = min(_TM_MAX, _round_up(B, sub_q))
        n_row = _cdiv(B, TM)
        if B >= _SPLIT_ROWS:
            n_row = max(n_row, 2)
        TM = _round_up(_cdiv(B, n_row), sub_q)
        while TM > sub_q and vmem_bytes(TM, TN, 2) > _VMEM_TILE_BUDGET:
            TM = max(sub_q, (TM // 2 // sub_q) * sub_q)
        n_row = _cdiv(B, TM)

        # Columns outer, rows inner: the M^T column tile stays VMEM-resident
        # while row tiles stream through the double-buffered pipeline.  With
        # n_col == 1 (usual case) x incurs no redundant HBM re-reads.
        call = pl.pallas_call(
            _spline_matmul_kernel,
            out_shape=jax.ShapeDtypeStruct((B, N), out_dtype),
            grid=(n_col, n_row),
            in_specs=[
                pl.BlockSpec((TM, w), lambda j, i: (i, 0)),    # x row tile
                pl.BlockSpec((w, TN), lambda j, i: (0, j)),    # M^T column tile
            ],
            out_specs=pl.BlockSpec((TM, TN), lambda j, i: (i, j)),
            compiler_params=pltpu.CompilerParams(
                dimension_semantics=("parallel", "parallel"),
                vmem_limit_bytes=_VMEM_LIMIT_BYTES),
            cost_estimate=cost,
        )

    def run(x, mt):
        # astype is a no-op on the default f32 path; in bf16 mode it halves the
        # x read and both matmul operands while accumulation stays f32.
        return call(x.astype(storage), mt)

    return jax.jit(run), mt_cols


class Spline:
    """JAX/Pallas port of the PyTorch `Spline` module (static w and rate).

    For fixed (w, upsample_rate) the forward is out = x @ M^T with a constant
    not-a-knot spline matrix, implemented as one lane-dense MXU matmul.
    """

    def __init__(self, upsample_rate: int, use_bf16: bool = False) -> None:
        self.upsample_rate = int(upsample_rate)
        # bf16 halves the dominant output write stream (N = w*r columns) and
        # the resident M^T; MXU accumulation stays f32.  Default stays f32
        # end-to-end to match the reference module's float32 output.
        name = "bfloat16" if use_bf16 else "float32"
        self._storage_name = name
        self._out_name = name

    def __call__(self, x: jax.Array) -> jax.Array:
        assert x.ndim == 1 or x.ndim == 2
        squeeze = x.ndim == 1
        if squeeze:
            x = x[None, :]
        B, w = x.shape
        assert w >= 4, "cubic spline needs at least 4 samples"
        N = w * self.upsample_rate

        run, mt_cols = _make_spline_fn(B, w, N, self._storage_name, self._out_name)
        mt = _cached_spline_matrix_t(w, self.upsample_rate, mt_cols,
                                     self._storage_name)
        out = run(x, mt)
        return out[0] if squeeze else out


if __name__ == "__main__":
    key = jax.random.PRNGKey(0)
    B, w, r = 2, 16, 4
    x = jax.random.normal(key, (B, w), dtype=jnp.float32)

    spline = Spline(upsample_rate=r)
    y = spline(x)
    jax.block_until_ready(y)
    assert y.shape == (B, w * r) and y.dtype == jnp.float32

    # Reference 1: plain-JAX matmul against the same spline matrix (kernel check).
    mt_ref = jnp.asarray(_notaknot_spline_matrix(w, r).T, dtype=jnp.float32)
    ref = x @ mt_ref
    np.testing.assert_allclose(np.asarray(y), np.asarray(ref),
                               rtol=1e-5, atol=1e-5)

    # Reference 2 (independent of the matrix builder): a not-a-knot interpolating
    # cubic spline reproduces cubic polynomials exactly, so the upsampled signal
    # must equal the polynomial evaluated on the query grid.
    xs = np.linspace(0.0, w - 1, w)
    xq = np.linspace(0.0, w - 1, w * r)
    poly = lambda t: 0.5 * t ** 3 - 2.0 * t ** 2 + 3.0 * t + 1.0
    y_poly = spline(jnp.asarray(poly(xs), dtype=jnp.float32))
    jax.block_until_ready(y_poly)
    np.testing.assert_allclose(np.asarray(y_poly), poly(xq), rtol=1e-4, atol=1e-2)

    # 1-D input path.
    y1 = spline(x[0])
    jax.block_until_ready(y1)
    assert y1.shape == (w * r,)
    np.testing.assert_allclose(np.asarray(y1), np.asarray(ref[0]),
                               rtol=1e-5, atol=1e-5)

    # Larger batch exercises the tiled / pipelined path (2 balanced row tiles,
    # masked lane tail on the output).
    xb = jax.random.normal(jax.random.PRNGKey(1), (160, w), dtype=jnp.float32)
    yb = Spline(upsample_rate=r)(xb)
    jax.block_until_ready(yb)
    np.testing.assert_allclose(np.asarray(yb), np.asarray(xb @ mt_ref),
                               rtol=1e-5, atol=1e-5)

    # bf16 mode: bf16 operands + bf16 output (f32 accumulation), loose tolerance.
    yb16 = Spline(upsample_rate=r, use_bf16=True)(x)
    jax.block_until_ready(yb16)
    assert yb16.dtype == jnp.bfloat16 and yb16.shape == (B, w * r)
    np.testing.assert_allclose(np.asarray(yb16).astype(np.float32),
                               np.asarray(ref), rtol=0.1, atol=0.1)

    print("KERNEL_OK")
</pallas_src>

<mosaic_0001>
module attributes {stable_mosaic.version = 11 : i64} {
  func.func @_spline_matmul_kernel(%arg0: memref<2x16xf32, #tpu.memory_space<vmem>>, %arg1: memref<16x64xf32, #tpu.memory_space<vmem>>, %arg2: memref<2x64xf32, #tpu.memory_space<vmem>>) attributes {dimension_semantics = [], scalar_prefetch = 0 : i64, scratch_operands = 0 : i64, tpu.core_type = #tpu.core_type<tc>} {
    %c0 = arith.constant 0 : index
    %c0_0 = arith.constant 0 : index
    %0 = vector.load %arg0[%c0, %c0_0] : memref<2x16xf32, #tpu.memory_space<vmem>>, vector<2x16xf32>
    %c0_1 = arith.constant 0 : index
    %c0_2 = arith.constant 0 : index
    %1 = vector.load %arg1[%c0_1, %c0_2] : memref<16x64xf32, #tpu.memory_space<vmem>>, vector<16x64xf32>
    %cst = arith.constant dense<0.000000e+00> : vector<2x64xf32>
    %2 = tpu.matmul %0, %1, %cst {dimension_numbers = #tpu.dot_dimension_numbers<[1], [0], [0], [1], [0, 0, 1, 1], [], []>} : vector<2x16xf32>, vector<16x64xf32>, vector<2x64xf32> -> vector<2x64xf32>
    %c0_3 = arith.constant 0 : index
    %c0_4 = arith.constant 0 : index
    %3 = vector.load %arg2[%c0_3, %c0_4] : memref<2x64xf32, #tpu.memory_space<vmem>>, vector<2x64xf32>
    tpu.vector_store %arg2[%c0_3, %c0_4], %2 {strides = array<i32>} : memref<2x64xf32, #tpu.memory_space<vmem>>, vector<2x64xf32>,
    return
  }
}

</mosaic_0001>

<bundles_post_ra>
// kernel: run.1
= control target key start
LH: loop header
LB: loop body
LE: loop exit
PB: predicated region body
PF: predicated region fallthrough
CT: control target
= control target key end

     0   :  { %7 = vsyncpa [#allocation3], 0  ;;  %s293_s0 = inlined_call_operand.hbm [shape: f32[2,16], index: 0, kind: input, shape index: {}]   ;;  %s294_s1 = inlined_call_operand.hbm [shape: f32[16,64], index: 1, kind: input, shape index: {}]   ;;  %s295_s2 = inlined_call_operand.hbm [shape: f32[2,64], index: 2, kind: output, shape index: {}]  }
   0x1   :  { %8 = vsyncpa [#allocation6], 0 }
   0x2   :  { %9 = vsyncpa [#allocation4], 0  ;;  %s227_s9 = smov [#allocation2]   ;;  %s228_s11 = smov [#allocation5]  }
   0x3   :  { %s16_s10 = sshll.u32 %s227_s9, 4  ;;  %s25_s12 = sshll.u32 %s228_s11, 4  ;;  %s17_s10 = int_to_ptr.vmem [resolvable:$true] %s16_s10  ;;  %s250_s12 = int_to_ptr.vmem [resolvable:$true] %s25_s12 }
   0x4   :  { %s155_s15 = scalar_lea.hbm %s293_s0, 32 }
   0x5   :  { %p156_p0 = scmp.ne.s32.totalorder %s293_s0, %s155_s15  ;;  %p159_p1 = scmp.lt.u32.totalorder %s155_s15, %s293_s0 }
   0x7   :  { %p161_p2 = pnand %p159_p1, %p156_p0 }
   0x9   :  { %164 = shalt.err (!%p161_p2)
}
   0xa   :  { %s165_s20 = scalar_lea.vmem %s17_s10, 32  ;;  %p170_p4 = scmp.lt.s32.totalorder %s17_s10, %s17_s10 }
   0xb   :  { %p166_p3 = scmp.ne.s32.totalorder %s17_s10, %s165_s20  ;;  %p171_p5 = scmp.lt.s32.totalorder %s165_s20, %s165_s20 }
   0xd   :  { %p172_p6 = por %p171_p5, %p170_p4 }
   0xf   :  { %p173_p7 = pnand %p172_p6, %p166_p3 }
  0x11   :  { %176 = shalt.err (!%p173_p7)
}
  0x12   :  { %19 = dma.hbm_to_vmem [thread:$0]  %s293_s0, 32, %s17_s10, [#allocation3]  }
  0x13   :  { %s177_s25 = scalar_lea.hbm %s294_s1, 256 }
  0x14   :  { %p178_p8 = scmp.ne.s32.totalorder %s294_s1, %s177_s25  ;;  %p181_p9 = scmp.lt.u32.totalorder %s177_s25, %s294_s1 }
  0x16   :  { %p183_p10 = pnand %p181_p9, %p178_p8 }
  0x18   :  { %186 = shalt.err (!%p183_p10)
}
  0x19   :  { %s187_s30 = scalar_lea.vmem %s250_s12, 256  ;;  %p192_p12 = scmp.lt.s32.totalorder %s250_s12, %s250_s12 }
  0x1a   :  { %p188_p11 = scmp.ne.s32.totalorder %s250_s12, %s187_s30  ;;  %p193_p13 = scmp.lt.s32.totalorder %s187_s30, %s187_s30 }
  0x1c   :  { %p194_p0 = por %p193_p13, %p192_p12 }
  0x1e   :  { %p195_p1 = pnand %p194_p0, %p188_p11 }
  0x20   :  { %198 = shalt.err (!%p195_p1)
}
  0x21   :  { %s229_s0 = smov 128   ;;  %s230_s3 = smov 8  }
  0x22   :  { %31 = dma.hbm_to_vmem [thread:$0]  %s294_s1, 256, %s250_s12, [#allocation6], %s229_s0, %s229_s0, %s230_s3  }
  0x23   :  { %221 = dma.done.wait [#allocation3], 32  }
  0x24   :  { %222 = vsyncadd [#allocation3], 4294967264 }
  0x25   :  { %223 = dma.done.wait [#allocation6], 256  }
  0x26   :  { %224 = vsyncadd [#allocation6], 4294967040  ;;  %v231_v0 = vmov 0.0|0.0   ;;  %vm232_vm0 = vmmov 0   ;;  %v233_v1 = vmov 0.0   ;;  %v39_v2 = vld [vmem:[#allocation5] sm:$0xff] }
  0x27   :  { %144 = vmatprep.subr.bf16.mxu0 %v231_v0  ;;  %141 = vmatprep.mubr.msk.f32.mxu0 %vm232_vm0, %v233_v1  ;;  %v40_v3 = vld [vmem:[#allocation5 + $0x8] sm:$0xff]  ;;  %v38_v5 = vld [vmem:[#allocation2] sm:$0x3]  ;;  %vm41_vm1 = vcmask 130048   ;;  %s234_s6 = smov [#allocation7]   ;;  %vm115_vm2 = vcmask 517120  }
  0x28   :  { %v145_v4 = vpack.c.bf16 %v40_v3, %v39_v2  ;;  %s123_s7 = sshll.u32 %s234_s6, 4  ;;  %s124_s7 = int_to_ptr.vmem [resolvable:$true] %s123_s7 }
  0x29   :  { %s199_s1 = scalar_lea.vmem %s124_s7, 32  ;;  %p204_p3 = scmp.lt.s32.totalorder %s124_s7, %s124_s7 }
  0x2a   :  { %146 = vmatpush3.bf16.msra.mxu0 %v145_v4  ;;  %p200_p2 = scmp.ne.s32.totalorder %s124_s7, %s199_s1  ;;  %p205_p4 = scmp.lt.s32.totalorder %s199_s1, %s199_s1 }
  0x2c   :  { %p206_p5 = por %p205_p4, %p204_p3 }
  0x2d   :  { %142 = vmatmul.mubr.msk.f32.vlgmr.msra.gmra.mrb[0].mxu0 %vm41_vm1, %v38_v5 }
  0x2e   :  { %p207_p6 = pnand %p206_p5, %p200_p2 }
 0x100   :  { %v111_v6 = vpop.f32.mrb[0].mxu0 }
 0x101   :  { %v143_v7 = vpop.f32.mrb[1].mxu0  ;;  %116 = vst.msk [vmem:[#allocation7] sm:$0x3] %vm115_vm2, %v111_v6 }
 0x102   :  { %210 = shalt.err (!%p207_p6)
}
 0x103   :  { %s211_s10 = scalar_lea.hbm %s295_s2, 32 }
 0x104   :  { %p212_p7 = scmp.ne.s32.totalorder %s295_s2, %s211_s10  ;;  %p215_p8 = scmp.lt.u32.totalorder %s211_s10, %s295_s2 }
 0x106   :  { %p217_p9 = pnand %p215_p8, %p212_p7 }
 0x108   :  { %220 = shalt.err (!%p217_p9)
}
 0x109   :  { %126 = dma.vmem_to_hbm [thread:$0]  %s124_s7, 32, %s295_s2, [#allocation4]  }
 0x10a   :  { %225 = dma.done.wait [#allocation4], 32  }
 0x10b   :  { %226 = vsyncadd [#allocation4], 4294967264 }
 0x10c   :  { %130 = vsyncpa [#allocation3], 1 }
 0x10d   :  { %131 = vsyncpa [#allocation6], 1 }
 0x10e   :  { %132 = vsyncpa [#allocation4], 1 }

</bundles_post_ra>
